<compile_context>
chip_gen: v7x
topology: tpu7x:2x2x1
jax: 0.10.0
libtpu: 0.0.40
codegen_flags: <defaults>
</compile_context>

<pallas_src>
import jax
import jax.numpy as jnp
from jax.experimental import pallas as pl
from jax.experimental.pallas import tpu as pltpu


_VMEM_BUDGET_BYTES = 20 * 1024 * 1024   # target for double-buffered tile footprint
_VMEM_LIMIT_BYTES = 32 * 1024 * 1024    # explicit scoped-VMEM limit (all generations)


# ---------------- kernels ----------------

def _linear_single_k_kernel(x_ref, w_ref, b_ref, o_ref):
    """Whole K in one block: one MXU call + bias add, no phases."""
    o_ref[...] = (
        jnp.dot(x_ref[...], w_ref[...], preferred_element_type=jnp.float32)
        + b_ref[...]
    ).astype(o_ref.dtype)


def _linear_multi_k_f32_kernel(x_ref, w_ref, b_ref, o_ref):
    """K tiled; f32 output: accumulate directly into the resident output block.
    Bias is folded into the k==0 initialization (no epilogue add)."""
    k = pl.program_id(2)

    @pl.when(k == 0)
    def _():
        o_ref[...] = jnp.broadcast_to(b_ref[...], o_ref.shape)

    o_ref[...] += jnp.dot(
        x_ref[...], w_ref[...], preferred_element_type=jnp.float32
    )


def _linear_multi_k_acc_kernel(x_ref, w_ref, b_ref, o_ref, acc_ref):
    """K tiled; non-f32 output: f32 scratch accumulator, bias folded into init."""
    k = pl.program_id(2)

    @pl.when(k == 0)
    def _():
        acc_ref[...] = jnp.broadcast_to(b_ref[...], acc_ref.shape).astype(jnp.float32)

    acc_ref[...] += jnp.dot(
        x_ref[...], w_ref[...], preferred_element_type=jnp.float32
    )

    @pl.when(k == pl.num_programs(2) - 1)
    def _():
        o_ref[...] = acc_ref[...].astype(o_ref.dtype)


# ---------------- tiling heuristics ----------------

def _round_up(x, m):
    return (x + m - 1) // m * m


def _divisors(dim, unit):
    """All multiples of `unit` that divide `dim`."""
    return [d for d in range(unit, dim + 1, unit) if dim % d == 0]


def _footprint_fits(tm, tk, tn, in_bytes, out_bytes):
    """Conservative double-buffered VMEM footprint for one grid step."""
    xb = 2 * in_bytes * tm * tk          # x tile (double-buffered)
    wb = 2 * in_bytes * tk * tn          # W tile (double-buffered)
    ob = 2 * out_bytes * tm * tn         # output tile (double-buffered)
    bb = 2 * 4 * tn                      # bias tile
    acc = 4 * tm * tn                    # possible f32 accumulator scratch
    return xb + wb + ob + bb + acc <= _VMEM_BUDGET_BYTES


def _select_tiles(Mp, Kp, Np, in_bytes, out_bytes):
    fits = lambda tm, tk, tn: _footprint_fits(tm, tk, tn, in_bytes, out_bytes)

    # Whole-M tile whenever the batch is small so W is streamed from HBM once.
    if Mp <= 512:
        tm = Mp
    else:
        tm = max(d for d in _divisors(Mp, 8) if d <= 256)

    # 1) whole-K, whole-N single shot.
    if fits(tm, Kp, Np):
        tn = Np
        # v7x: give the second TensorCore a parallel slice when the grid is (1,1).
        if Mp // tm == 1 and Np % 256 == 0 and Np // 2 >= 256:
            tn = Np // 2
        return tm, Kp, tn

    # 2) whole-K, lane-dense tiled N (largest tile that fits).
    n_tiles = [d for d in _divisors(Np, 128) if fits(tm, Kp, d)]
    if n_tiles:
        return tm, Kp, max(n_tiles)

    # 3) tiled K (reduction axis last). Prefer tk >= 512 so the per-step
    #    accumulator read-modify-write amortizes (esp. on v5e), then large tn/tk.
    best_key, best = None, None
    for tn in (d for d in _divisors(Np, 128) if d <= 512):
        for tk in _divisors(Kp, 128):
            if fits(tm, tk, tn):
                key = (tk >= 512, tn, tk)
                if best_key is None or key > best_key:
                    best_key, best = key, (tm, tk, tn)
    if best is not None:
        return best
    return tm, 128, 128  # last-resort minimal tiles


# ---------------- wrapper ----------------

def class_predict_init(W, b, *, use_bf16=False):
    """Pad (and optionally bf16-cast) the weights ONCE, hoisted out of the forward."""
    K, N = W.shape
    assert b.shape == (N,)
    Kp, Np = _round_up(K, 128), _round_up(N, 128)
    if (Kp, Np) != (K, N):
        W = jnp.pad(W, ((0, Kp - K), (0, Np - N)))
    if Np != N:
        b = jnp.pad(b, (0, Np - N))
    if use_bf16:
        W = W.astype(jnp.bfloat16)
    return {
        "W": W,
        "b2d": b.reshape(1, Np).astype(jnp.float32),
        "K": K,
        "N": N,
        "use_bf16": use_bf16,
    }


def class_predict_forward(x, params):
    W, b2d = params["W"], params["b2d"]
    K, N = params["K"], params["N"]
    Kp, Np = W.shape
    M, Kx = x.shape
    assert Kx == K
    out_dtype = x.dtype

    # Per-call padding touches only x (cheap); W/b were padded once in init.
    Mp = _round_up(M, 8)
    if (Mp, Kp) != (M, K):
        x = jnp.pad(x, ((0, Mp - M), (0, Kp - K)))
    if params["use_bf16"]:
        x = x.astype(jnp.bfloat16)

    in_bytes = jnp.dtype(x.dtype).itemsize
    out_bytes = jnp.dtype(out_dtype).itemsize
    tm, tk, tn = _select_tiles(Mp, Kp, Np, in_bytes, out_bytes)
    gm, gn, gk = Mp // tm, Np // tn, Kp // tk

    params_2d = pltpu.CompilerParams(
        dimension_semantics=("parallel", "parallel"),
        vmem_limit_bytes=_VMEM_LIMIT_BYTES,
    )
    params_3d = pltpu.CompilerParams(
        dimension_semantics=("parallel", "parallel", "arbitrary"),
        vmem_limit_bytes=_VMEM_LIMIT_BYTES,
    )

    if gk == 1:
        # K fits in one block: single-shot kernel, 2-D parallel grid, no scratch.
        out = pl.pallas_call(
            _linear_single_k_kernel,
            out_shape=jax.ShapeDtypeStruct((Mp, Np), out_dtype),
            grid_spec=pltpu.PrefetchScalarGridSpec(
                num_scalar_prefetch=0,
                grid=(gm, gn),
                in_specs=[
                    pl.BlockSpec((tm, Kp), lambda i, j: (i, 0)),   # x panel
                    pl.BlockSpec((Kp, tn), lambda i, j: (0, j)),   # W panel
                    pl.BlockSpec((1, tn), lambda i, j: (0, j)),    # bias tile
                ],
                out_specs=pl.BlockSpec((tm, tn), lambda i, j: (i, j)),
            ),
            compiler_params=params_2d,
        )(x, W, b2d)
    else:
        # K tiled: reduction axis last, output block resident across it.
        in_specs = [
            pl.BlockSpec((tm, tk), lambda i, j, k: (i, k)),   # x tile
            pl.BlockSpec((tk, tn), lambda i, j, k: (k, j)),   # W tile
            pl.BlockSpec((1, tn), lambda i, j, k: (0, j)),    # bias tile
        ]
        out_spec = pl.BlockSpec((tm, tn), lambda i, j, k: (i, j))
        if out_dtype == jnp.float32:
            out = pl.pallas_call(
                _linear_multi_k_f32_kernel,
                out_shape=jax.ShapeDtypeStruct((Mp, Np), out_dtype),
                grid_spec=pltpu.PrefetchScalarGridSpec(
                    num_scalar_prefetch=0,
                    grid=(gm, gn, gk),
                    in_specs=in_specs,
                    out_specs=out_spec,
                ),
                compiler_params=params_3d,
            )(x, W, b2d)
        else:
            out = pl.pallas_call(
                _linear_multi_k_acc_kernel,
                out_shape=jax.ShapeDtypeStruct((Mp, Np), out_dtype),
                grid_spec=pltpu.PrefetchScalarGridSpec(
                    num_scalar_prefetch=0,
                    grid=(gm, gn, gk),
                    in_specs=in_specs,
                    out_specs=out_spec,
                    scratch_shapes=[pltpu.VMEM((tm, tn), jnp.float32)],
                ),
                compiler_params=params_3d,
            )(x, W, b2d)

    if (Mp, Np) != (M, N):
        out = out[:M, :N]
    return out


def class_predict(x, W, b, *, use_bf16=False):
    """Convenience one-shot wrapper (pads weights per call; prefer init+forward)."""
    return class_predict_forward(x, class_predict_init(W, b, use_bf16=use_bf16))


if __name__ == "__main__":
    key = jax.random.PRNGKey(0)

    # --- main test: shapes consistent with the module (batch=8, in=256, cls=128) ---
    batch, input_size, classification = 8, 256, 128
    kx, kw = jax.random.split(key)
    W = jax.random.normal(kw, (input_size, classification), dtype=jnp.float32)
    b = jnp.zeros((classification,), dtype=jnp.float32)  # matches zeros init
    x = jax.random.normal(kx, (batch, input_size), dtype=jnp.float32)

    prm = class_predict_init(W, b)                     # weights padded once
    y = jax.block_until_ready(class_predict_forward(x, prm))
    y_ref = x @ W + b
    assert jnp.allclose(y, y_ref, atol=1e-4, rtol=1e-4), "mismatch vs reference"

    # --- secondary test: unaligned shapes (padding + whole-K panel path) ---
    k2x, k2w, k2b = jax.random.split(jax.random.PRNGKey(1), 3)
    M2, K2, N2 = 13, 1100, 300
    x2 = jax.random.normal(k2x, (M2, K2), dtype=jnp.float32)
    W2 = jax.random.normal(k2w, (K2, N2), dtype=jnp.float32)
    b2 = jax.random.normal(k2b, (N2,), dtype=jnp.float32)
    prm2 = class_predict_init(W2, b2)
    y2 = jax.block_until_ready(class_predict_forward(x2, prm2))
    y2_ref = x2 @ W2 + b2
    assert jnp.allclose(y2, y2_ref, atol=1e-3, rtol=1e-3), "mismatch (unaligned path)"

    # --- third test: N split in two parallel tiles (v7x 2-TC path; harmless on 1-TC) ---
    k3x, k3w, k3b = jax.random.split(jax.random.PRNGKey(2), 3)
    M3, K3, N3 = 16, 512, 512
    x3 = jax.random.normal(k3x, (M3, K3), dtype=jnp.float32)
    W3 = jax.random.normal(k3w, (K3, N3), dtype=jnp.float32)
    b3 = jax.random.normal(k3b, (N3,), dtype=jnp.float32)
    prm3 = class_predict_init(W3, b3)
    y3 = jax.block_until_ready(class_predict_forward(x3, prm3))
    y3_ref = x3 @ W3 + b3
    assert jnp.allclose(y3, y3_ref, atol=1e-3, rtol=1e-3), "mismatch (split-N path)"

    # --- opt-in bf16 path (numerics-affecting; looser tolerance) ---
    prm_bf16 = class_predict_init(W, b, use_bf16=True)
    y_bf16 = jax.block_until_ready(class_predict_forward(x, prm_bf16))
    assert jnp.allclose(y_bf16, y_ref, atol=0.5, rtol=2e-2), "mismatch (bf16 path)"

    print("KERNEL_OK")
</pallas_src>

<mosaic_0001>
module attributes {stable_mosaic.version = 11 : i64} {
  func.func @_linear_single_k_kernel(%arg0: i32, %arg1: i32, %arg2: memref<8x256xf32, #tpu.memory_space<vmem>>, %arg3: memref<256x128xf32, #tpu.memory_space<vmem>>, %arg4: memref<1x128xf32, #tpu.memory_space<vmem>>, %arg5: memref<8x128xf32, #tpu.memory_space<vmem>>) attributes {dimension_semantics = [#tpu.dimension_semantics<parallel>, #tpu.dimension_semantics<parallel>], iteration_bounds = array<i64: 1, 1>, scalar_prefetch = 0 : i64, scratch_operands = 0 : i64, tpu.core_type = #tpu.core_type<tc>, window_params = [{transform_indices = @transform_0, window_bounds = array<i64: 8, 256>}, {transform_indices = @transform_1, window_bounds = array<i64: 256, 128>}, {transform_indices = @transform_2, window_bounds = array<i64: 1, 128>}, {transform_indices = @transform_3, window_bounds = array<i64: 8, 128>}]} {
    %c0 = arith.constant 0 : index
    %c0_0 = arith.constant 0 : index
    %0 = vector.load %arg2[%c0, %c0_0] : memref<8x256xf32, #tpu.memory_space<vmem>>, vector<8x256xf32>
    %c0_1 = arith.constant 0 : index
    %c0_2 = arith.constant 0 : index
    %1 = vector.load %arg3[%c0_1, %c0_2] : memref<256x128xf32, #tpu.memory_space<vmem>>, vector<256x128xf32>
    %cst = arith.constant dense<0.000000e+00> : vector<8x128xf32>
    %2 = tpu.matmul %0, %1, %cst {dimension_numbers = #tpu.dot_dimension_numbers<[1], [0], [0], [1], [0, 0, 1, 1], [], []>} : vector<8x256xf32>, vector<256x128xf32>, vector<8x128xf32> -> vector<8x128xf32>
    %c0_3 = arith.constant 0 : index
    %c0_4 = arith.constant 0 : index
    %3 = vector.load %arg4[%c0_3, %c0_4] : memref<1x128xf32, #tpu.memory_space<vmem>>, vector<1x128xf32>
    %4 = vector.broadcast %3 : vector<1x128xf32> to vector<8x128xf32>
    %5 = arith.addf %2, %4 : vector<8x128xf32>
    %c0_5 = arith.constant 0 : index
    %c0_6 = arith.constant 0 : index
    %6 = vector.load %arg5[%c0_5, %c0_6] : memref<8x128xf32, #tpu.memory_space<vmem>>, vector<8x128xf32>
    tpu.vector_store %arg5[%c0_5, %c0_6], %5 {strides = array<i32>} : memref<8x128xf32, #tpu.memory_space<vmem>>, vector<8x128xf32>,
    return
  }
  func.func @transform_0(%arg0: i32, %arg1: i32) -> (i32, i32) {
    %c0_i32 = arith.constant 0 : i32
    %c0_i32_0 = arith.constant 0 : i32
    return %arg0, %c0_i32 : i32, i32
  }
  func.func @transform_1(%arg0: i32, %arg1: i32) -> (i32, i32) {
    %c0_i32 = arith.constant 0 : i32
    %c0_i32_0 = arith.constant 0 : i32
    return %c0_i32, %arg1 : i32, i32
  }
  func.func @transform_2(%arg0: i32, %arg1: i32) -> (i32, i32) {
    %c0_i32 = arith.constant 0 : i32
    %c0_i32_0 = arith.constant 0 : i32
    return %c0_i32, %arg1 : i32, i32
  }
  func.func @transform_3(%arg0: i32, %arg1: i32) -> (i32, i32) {
    %c0_i32 = arith.constant 0 : i32
    return %arg0, %arg1 : i32, i32
  }
}

</mosaic_0001>

<bundles_post_ra>
// kernel: tpu_custom_call.1
= control target key start
LH: loop header
LB: loop body
LE: loop exit
PB: predicated region body
PF: predicated region fallthrough
CT: control target
= control target key end

     0   :  { %8 = vsyncpa [#allocation3], 0  ;;  %s385_s0 = inlined_call_operand.hbm [shape: f32[8,256], index: 0, kind: input, shape index: {}]   ;;  %s386_s1 = inlined_call_operand.hbm [shape: f32[256,128], index: 1, kind: input, shape index: {}]   ;;  %s387_s2 = inlined_call_operand.vmem [shape: f32[1,128], index: 2, kind: input, shape index: {}]   ;;  %s388_s3 = inlined_call_operand.hbm [shape: f32[8,128], index: 3, kind: output, shape index: {}]  }
   0x1   :  { %9 = vsyncpa [#allocation6], 0 }
   0x2   :  { %10 = vsyncpa [#allocation4], 0  ;;  %s314_s12 = smov [#allocation2]   ;;  %s315_s14 = smov [#allocation5]  }
   0x3   :  { %s17_s13 = sshll.u32 %s314_s12, 4  ;;  %s26_s15 = sshll.u32 %s315_s14, 4  ;;  %s18_s13 = int_to_ptr.vmem [resolvable:$true] %s17_s13  ;;  %s339_s15 = int_to_ptr.vmem [resolvable:$true] %s26_s15 }
   0x4   :  { %s242_s18 = scalar_lea.hbm %s385_s0, 256 }
   0x5   :  { %p243_p0 = scmp.ne.s32.totalorder %s385_s0, %s242_s18  ;;  %p246_p1 = scmp.lt.u32.totalorder %s242_s18, %s385_s0 }
   0x7   :  { %p248_p2 = pnand %p246_p1, %p243_p0 }
   0x9   :  { %251 = shalt.err (!%p248_p2)
}
   0xa   :  { %s252_s23 = scalar_lea.vmem %s18_s13, 256  ;;  %p257_p4 = scmp.lt.s32.totalorder %s18_s13, %s18_s13 }
   0xb   :  { %p253_p3 = scmp.ne.s32.totalorder %s18_s13, %s252_s23  ;;  %p258_p5 = scmp.lt.s32.totalorder %s252_s23, %s252_s23 }
   0xd   :  { %p259_p6 = por %p258_p5, %p257_p4 }
   0xf   :  { %p260_p7 = pnand %p259_p6, %p253_p3 }
  0x11   :  { %263 = shalt.err (!%p260_p7)
}
  0x12   :  { %20 = dma.hbm_to_vmem [thread:$0]  %s385_s0, 256, %s18_s13, [#allocation3]  }
  0x13   :  { %s264_s28 = scalar_lea.hbm %s386_s1, 4096 }
  0x14   :  { %p265_p8 = scmp.ne.s32.totalorder %s386_s1, %s264_s28  ;;  %p268_p9 = scmp.lt.u32.totalorder %s264_s28, %s386_s1 }
  0x16   :  { %p270_p10 = pnand %p268_p9, %p265_p8 }
  0x18   :  { %273 = shalt.err (!%p270_p10)
}
  0x19   :  { %s274_s6 = scalar_lea.vmem %s339_s15, 4096  ;;  %p279_p12 = scmp.lt.s32.totalorder %s339_s15, %s339_s15 }
  0x1a   :  { %p275_p11 = scmp.ne.s32.totalorder %s339_s15, %s274_s6  ;;  %p280_p13 = scmp.lt.s32.totalorder %s274_s6, %s274_s6 }
  0x1c   :  { %p281_p0 = por %p280_p13, %p279_p12 }
  0x1e   :  { %p282_p1 = pnand %p281_p0, %p275_p11 }
  0x20   :  { %285 = shalt.err (!%p282_p1)
}
  0x21   :  { %s316_s0 = smov 128   ;;  %s317_s7 = smov 8  }
  0x22   :  { %32 = dma.hbm_to_vmem [thread:$0]  %s386_s1, 4096, %s339_s15, [#allocation6], %s316_s0, %s316_s0, %s317_s7  }
  0x23   :  { %308 = dma.done.wait [#allocation3], 256  }
  0x24   :  { %309 = vsyncadd [#allocation3], 4294967040 }
  0x25   :  { %310 = dma.done.wait [#allocation6], 4096  }
  0x26   :  { %311 = vsyncadd [#allocation6], 4294963200  ;;  %v59_v0 = vld [vmem:[#allocation5 + $0x80] sm:$0xff]  ;;  %v60_v1 = vld [vmem:[#allocation5 + $0x88] sm:$0xff]  ;;  %s318_s11 = smov [#allocation7]  }
  0x27   :  { %v43_v2 = vld [vmem:[#allocation5] sm:$0xff]  ;;  %v205_v3 = vpack.c.bf16 %v60_v1, %v59_v0  ;;  %v44_v4 = vld [vmem:[#allocation5 + $0x8] sm:$0xff]  ;;  %v61_v5 = vld [vmem:[#allocation5 + $0x90] sm:$0xff]  ;;  %s159_s12 = sshll.u32 %s318_s11, 4  ;;  %s160_s12 = int_to_ptr.vmem [resolvable:$true] %s159_s12 }
  0x28   :  { %v62_v6 = vld [vmem:[#allocation5 + $0x98] sm:$0xff]  ;;  %v207_v7 = vpack.c.bf16 %v44_v4, %v43_v2  ;;  %v45_v9 = vld [vmem:[#allocation5 + $0x10] sm:$0xff]  ;;  %v63_v11 = vld [vmem:[#allocation5 + $0xa0] sm:$0xff]  ;;  %s286_s13 = scalar_lea.vmem %s160_s12, 128  ;;  %p291_p3 = scmp.lt.s32.totalorder %s160_s12, %s160_s12 }
  0x29   :  { %v209_v8 = vpack.c.bf16 %v62_v6, %v61_v5  ;;  %v46_v10 = vld [vmem:[#allocation5 + $0x18] sm:$0xff]  ;;  %206 = vmatprep.subr.bf16.mxu0 %v205_v3  ;;  %v64_v12 = vld [vmem:[#allocation5 + $0xa8] sm:$0xff]  ;;  %v47_v15 = vld [vmem:[#allocation5 + $0x20] sm:$0xff]  ;;  %p287_p2 = scmp.ne.s32.totalorder %s160_s12, %s286_s13  ;;  %p292_p4 = scmp.lt.s32.totalorder %s286_s13, %s286_s13 }
  0x2a   :  { %208 = vmatpush3.bf16.msra.mxu0 %v207_v7  ;;  %v211_v13 = vpack.c.bf16 %v46_v10, %v45_v9  ;;  %v213_v14 = vpack.c.bf16 %v64_v12, %v63_v11  ;;  %v48_v16 = vld [vmem:[#allocation5 + $0x28] sm:$0xff]  ;;  %v65_v17 = vld [vmem:[#allocation5 + $0xb0] sm:$0xff]  ;;  %v66_v18 = vld [vmem:[#allocation5 + $0xb8] sm:$0xff] }
  0x2b   :  { %210 = vmatprep.subr.bf16.mxu0 %v209_v8  ;;  %v215_v19 = vpack.c.bf16 %v48_v16, %v47_v15  ;;  %v217_v20 = vpack.c.bf16 %v66_v18, %v65_v17  ;;  %v49_v21 = vld [vmem:[#allocation5 + $0x30] sm:$0xff]  ;;  %v50_v22 = vld [vmem:[#allocation5 + $0x38] sm:$0xff]  ;;  %v67_v23 = vld [vmem:[#allocation5 + $0xc0] sm:$0xff]  ;;  %p293_p5 = por %p292_p4, %p291_p3 }
  0x2c   :  { %v68_v24 = vld [vmem:[#allocation5 + $0xc8] sm:$0xff]  ;;  %v42_v25 = vld [vmem:[#allocation2 + $0x8] sm:$0xff]  ;;  %v219_v26 = vpack.c.bf16 %v50_v22, %v49_v21  ;;  %v51_v28 = vld [vmem:[#allocation5 + $0x40] sm:$0xff] }
  0x2d   :  { %146 = vmatprep.mubr.f32.mxu0 %v42_v25  ;;  %v221_v27 = vpack.c.bf16 %v68_v24, %v67_v23  ;;  %v52_v29 = vld [vmem:[#allocation5 + $0x48] sm:$0xff]  ;;  %v69_v30 = vld [vmem:[#allocation5 + $0xd0] sm:$0xff]  ;;  %v70_v31 = vld [vmem:[#allocation5 + $0xd8] sm:$0xff]  ;;  %p294_p6 = pnand %p293_p5, %p287_p2 }
  0x2e   :  { %212 = vmatpush3.bf16.msra.mxu0 %v211_v13  ;;  %v223_v32 = vpack.c.bf16 %v52_v29, %v51_v28  ;;  %v225_v33 = vpack.c.bf16 %v70_v31, %v69_v30  ;;  %v53_v34 = vld [vmem:[#allocation5 + $0x50] sm:$0xff]  ;;  %v54_v35 = vld [vmem:[#allocation5 + $0x58] sm:$0xff]  ;;  %v71_v36 = vld [vmem:[#allocation5 + $0xe0] sm:$0xff] }
  0x2f   :  { %214 = vmatprep.subr.bf16.mxu0 %v213_v14  ;;  %v72_v37 = vld [vmem:[#allocation5 + $0xe8] sm:$0xff]  ;;  %v227_v38 = vpack.c.bf16 %v54_v35, %v53_v34  ;;  %v55_v40 = vld [vmem:[#allocation5 + $0x60] sm:$0xff]  ;;  %v73_v42 = vld [vmem:[#allocation5 + $0xf0] sm:$0xff] }
  0x30   :  { %v229_v39 = vpack.c.bf16 %v72_v37, %v71_v36  ;;  %v56_v41 = vld [vmem:[#allocation5 + $0x68] sm:$0xff]  ;;  %v74_v43 = vld [vmem:[#allocation5 + $0xf8] sm:$0xff]  ;;  %v57_v46 = vld [vmem:[#allocation5 + $0x70] sm:$0xff] }
  0x31   :  { %v231_v44 = vpack.c.bf16 %v56_v41, %v55_v40  ;;  %v233_v45 = vpack.c.bf16 %v74_v43, %v73_v42  ;;  %v58_v47 = vld [vmem:[#allocation5 + $0x78] sm:$0xff]  ;;  %v41_v49 = vld [vmem:[#allocation2] sm:$0xff] }
  0x32   :  { %216 = vmatpush3.bf16.msra.mxu0 %v215_v19  ;;  %v235_v48 = vpack.c.bf16 %v58_v47, %v57_v46  ;;  %v169_v51 = vld [vmem:[%s387_s2] ss:$0 sm:$0xff] }
  0x33   :  { %218 = vmatprep.subr.bf16.mxu0 %v217_v20 }
  0x36   :  { %220 = vmatpush3.bf16.msra.mxu0 %v219_v26 }
  0x37   :  { %222 = vmatprep.subr.bf16.mxu0 %v221_v27 }
  0x3a   :  { %224 = vmatpush3.bf16.msra.mxu0 %v223_v32 }
  0x3b   :  { %226 = vmatprep.subr.bf16.mxu0 %v225_v33 }
  0x3e   :  { %228 = vmatpush3.bf16.msra.mxu0 %v227_v38 }
  0x3f   :  { %230 = vmatprep.subr.bf16.mxu0 %v229_v39 }
  0x42   :  { %232 = vmatpush3.bf16.msra.mxu0 %v231_v44 }
  0x43   :  { %234 = vmatprep.subr.bf16.mxu0 %v233_v45 }
  0x46   :  { %236 = vmatpush3.bf16.msra.mxu0 %v235_v48 }
  0x49   :  { %147 = vmatmul.mubr.f32.vlgmr.msra.gmra.mrb[0].mxu0 %v41_v49 }
 0x11c   :  { %v202_v50 = vpop.f32.mrb[0].mxu0 }
 0x11d   :  { %v203_v52 = vpop.f32.mrb[1].mxu0 }
 0x11e   :  { %v204_v53 = vadd.f32 %v203_v52, %v202_v50 }
 0x120   :  { %v149_v54 = vadd.f32 %v204_v53, %v169_v51 }
 0x122   :  { %152 = vst [vmem:[#allocation7] sm:$0xff] %v149_v54 }
 0x123   :  { %297 = shalt.err (!%p294_p6)
}
 0x124   :  { %s298_s16 = scalar_lea.hbm %s388_s3, 128 }
 0x125   :  { %p299_p7 = scmp.ne.s32.totalorder %s388_s3, %s298_s16  ;;  %p302_p8 = scmp.lt.u32.totalorder %s298_s16, %s388_s3 }
 0x127   :  { %p304_p9 = pnand %p302_p8, %p299_p7 }
 0x129   :  { %307 = shalt.err (!%p304_p9)
}
 0x12a   :  { %162 = dma.vmem_to_hbm [thread:$0]  %s160_s12, 128, %s388_s3, [#allocation4]  }
 0x12b   :  { %312 = dma.done.wait [#allocation4], 128  }
 0x12c   :  { %313 = vsyncadd [#allocation4], 4294967168 }
 0x12d   :  { %166 = vsyncpa [#allocation3], 1 }
 0x12e   :  { %167 = vsyncpa [#allocation6], 1 }
 0x12f   :  { %168 = vsyncpa [#allocation4], 1 }

</bundles_post_ra>
